<compile_context>
chip_gen: v5e
topology: v5e:2x2
jax: 0.10.0
libtpu: 0.0.40
codegen_flags: <defaults>
</compile_context>

<pallas_src>
import math

import jax
import jax.numpy as jnp
from jax.experimental import pallas as pl
from jax.experimental.pallas import tpu as pltpu


def _round_up(n: int, m: int) -> int:
    return ((n + m - 1) // m) * m


def _causal_conv_tanh_kernel(xp_ref, w_ref, b_ref, o_ref):
    # xp_ref: (Lp, d_feature)          left/right zero-padded input for this batch element
    # w_ref : (k, d_feature, d_model)  conv weight, tap-major
    # b_ref : (1, d_model)             conv bias
    # o_ref : (ts, d_model)            output tile (seq tile on sublanes, full d_model on lanes)
    ts, dm = o_ref.shape
    k, df, _ = w_ref.shape

    # Start row of this seq tile inside the padded input (ts is a multiple of 8).
    base = pl.multiple_of(pl.program_id(1) * ts, 8)

    # Fold the bias into the accumulator init (one fewer full-tile VPU pass).
    acc = jnp.broadcast_to(b_ref[...], (ts, dm)).astype(jnp.float32)

    for j in range(k):                                   # k is small & static -> unrolled
        xs = xp_ref[pl.ds(base + j, ts), :]              # (ts, df) shifted window
        wj = w_ref[j]                                    # (df, dm)
        if df <= 8:
            # Tiny contraction dim: VPU broadcast multiply-accumulate (avoids a
            # degenerate (ts, df) @ (df, dm) MXU matmul with df ~ 1).
            for c in range(df):
                acc = acc + xs[:, c:c + 1] * wj[c:c + 1, :]
        else:
            acc = acc + jnp.dot(xs, wj, preferred_element_type=jnp.float32)

    o_ref[...] = jnp.tanh(acc).astype(o_ref.dtype)


def context_embedding(x: jax.Array, weight: jax.Array, bias: jax.Array,
                      *, seq_tile: int = 512) -> jax.Array:
    """Equivalent of context_embedding(d_feature, d_model, k).forward(x).

    x:      (batch, seq, d_feature) float32
    weight: (d_model, d_feature, k)  -- torch Conv1d weight layout
    bias:   (d_model,)
    returns (batch, seq, d_model) float32
    """
    B, L, df = x.shape
    dm, df_w, k = weight.shape
    assert df == df_w, (df, df_w)

    # Seq tile: multiple of 8, capped at seq_tile; pad compute length to a tile multiple.
    ts = min(seq_tile, _round_up(L, 8))
    Lc = _round_up(L, ts)

    # Causal left pad (k-1 zeros) + right pad to the tile-aligned compute length.
    x_pad = jnp.pad(x.astype(jnp.float32), ((0, 0), (k - 1, Lc - L), (0, 0)))
    w2 = jnp.transpose(weight, (2, 1, 0)).astype(jnp.float32)   # (k, d_feature, d_model)
    b2 = bias.reshape(1, dm).astype(jnp.float32)                # (1, d_model)

    grid = (B, Lc // ts)
    Lp = Lc + k - 1

    cost = pl.CostEstimate(
        flops=2 * B * Lc * dm * k * df + B * Lc * dm,
        transcendentals=B * Lc * dm,
        bytes_accessed=4 * (B * Lp * df + k * df * dm + dm + B * Lc * dm),
    )

    out = pl.pallas_call(
        _causal_conv_tanh_kernel,
        out_shape=jax.ShapeDtypeStruct((B, Lc, dm), jnp.float32),
        grid=grid,
        in_specs=[
            # Whole padded sequence for batch b: block index constant across seq tiles,
            # so it stays resident in VMEM (no re-DMA per tile).
            pl.BlockSpec((None, Lp, df), lambda b, i: (b, 0, 0)),
            pl.BlockSpec((k, df, dm), lambda b, i: (0, 0, 0)),
            pl.BlockSpec((1, dm), lambda b, i: (0, 0)),
        ],
        out_specs=pl.BlockSpec((None, ts, dm), lambda b, i: (b, i, 0)),
        compiler_params=pltpu.CompilerParams(
            dimension_semantics=("parallel", "parallel")),
        cost_estimate=cost,
    )(x_pad, w2, b2)

    return out[:, :L, :]


def _reference(x, weight, bias):
    # Pure-JAX reference mirroring the PyTorch module exactly.
    B, L, df = x.shape
    dm, _, k = weight.shape
    xp = jnp.pad(x.astype(jnp.float32), ((0, 0), (k - 1, 0), (0, 0)))
    out = jnp.zeros((B, L, dm), jnp.float32) + bias.astype(jnp.float32)
    for j in range(k):
        out = out + jnp.einsum('blc,oc->blo', xp[:, j:j + L, :],
                               weight[:, :, j].astype(jnp.float32))
    return jnp.tanh(out)


if __name__ == "__main__":
    key = jax.random.PRNGKey(0)
    batch, seq, d_feature, d_model, k = 2, 8, 1, 256, 5

    kx, kw, kb = jax.random.split(key, 3)
    x = jax.random.normal(kx, (batch, seq, d_feature), dtype=jnp.float32)
    bound = 1.0 / math.sqrt(d_feature * k)      # torch Conv1d default init scale
    weight = jax.random.uniform(kw, (d_model, d_feature, k), jnp.float32, -bound, bound)
    bias = jax.random.uniform(kb, (d_model,), jnp.float32, -bound, bound)

    out = context_embedding(x, weight, bias)
    out = jax.block_until_ready(out)

    ref = _reference(x, weight, bias)
    assert out.shape == (batch, seq, d_model), out.shape
    assert out.dtype == jnp.float32, out.dtype
    assert jnp.allclose(out, ref, atol=1e-4, rtol=1e-4), "mismatch vs reference"

    print("KERNEL_OK")
</pallas_src>

<mosaic_0001>
module attributes {stable_mosaic.version = 11 : i64} {
  func.func @_causal_conv_tanh_kernel(%arg0: i32, %arg1: i32, %arg2: memref<1x12x1xf32, #tpu.memory_space<vmem>>, %arg3: memref<5x1x256xf32, #tpu.memory_space<vmem>>, %arg4: memref<1x256xf32, #tpu.memory_space<vmem>>, %arg5: memref<1x8x256xf32, #tpu.memory_space<vmem>>) attributes {dimension_semantics = [#tpu.dimension_semantics<parallel>, #tpu.dimension_semantics<parallel>], iteration_bounds = array<i64: 2, 1>, scalar_prefetch = 0 : i64, scratch_operands = 0 : i64, tpu.core_type = #tpu.core_type<tc>, window_params = [{transform_indices = @transform_0, window_bounds = array<i64: 1, 12, 1>}, {pipeline_mode = #tpu.pipeline_mode<synchronous>, transform_indices = @transform_1, window_bounds = array<i64: 5, 1, 256>}, {pipeline_mode = #tpu.pipeline_mode<synchronous>, transform_indices = @transform_2, window_bounds = array<i64: 1, 256>}, {transform_indices = @transform_3, window_bounds = array<i64: 1, 8, 256>}]} {
    %c8_i32 = arith.constant 8 : i32
    %0 = arith.muli %arg1, %c8_i32 : i32
    %1 = tpu.assume_multiple %0, 8 : i32
    %c0 = arith.constant 0 : index
    %c0_0 = arith.constant 0 : index
    %2 = vector.load %arg4[%c0, %c0_0] : memref<1x256xf32, #tpu.memory_space<vmem>>, vector<1x256xf32>
    %3 = vector.shape_cast %2 : vector<1x256xf32> to vector<1x256xf32>
    %4 = vector.broadcast %3 : vector<1x256xf32> to vector<8x256xf32>
    %c0_i32 = arith.constant 0 : i32
    %5 = arith.addi %1, %c0_i32 : i32
    %c0_1 = arith.constant 0 : index
    %6 = arith.index_cast %5 : i32 to index
    %c0_2 = arith.constant 0 : index
    %7 = vector.load %arg2[%c0_1, %6, %c0_2] : memref<1x12x1xf32, #tpu.memory_space<vmem>>, vector<1x8x1xf32>
    %8 = vector.shape_cast %7 : vector<1x8x1xf32> to vector<8x1xf32>
    %c0_3 = arith.constant 0 : index
    %c0_4 = arith.constant 0 : index
    %c0_5 = arith.constant 0 : index
    %9 = vector.load %arg3[%c0_3, %c0_4, %c0_5] : memref<5x1x256xf32, #tpu.memory_space<vmem>>, vector<1x1x256xf32>
    %10 = vector.shape_cast %9 : vector<1x1x256xf32> to vector<1x256xf32>
    %11 = vector.broadcast %8 : vector<8x1xf32> to vector<8x256xf32>
    %12 = vector.broadcast %10 : vector<1x256xf32> to vector<8x256xf32>
    %13 = arith.mulf %11, %12 : vector<8x256xf32>
    %14 = arith.addf %4, %13 : vector<8x256xf32>
    %c1_i32 = arith.constant 1 : i32
    %15 = arith.addi %1, %c1_i32 : i32
    %c0_6 = arith.constant 0 : index
    %16 = arith.index_cast %15 : i32 to index
    %c0_7 = arith.constant 0 : index
    %17 = vector.load %arg2[%c0_6, %16, %c0_7] : memref<1x12x1xf32, #tpu.memory_space<vmem>>, vector<1x8x1xf32>
    %18 = vector.shape_cast %17 : vector<1x8x1xf32> to vector<8x1xf32>
    %c1 = arith.constant 1 : index
    %c0_8 = arith.constant 0 : index
    %c0_9 = arith.constant 0 : index
    %19 = vector.load %arg3[%c1, %c0_8, %c0_9] : memref<5x1x256xf32, #tpu.memory_space<vmem>>, vector<1x1x256xf32>
    %20 = vector.shape_cast %19 : vector<1x1x256xf32> to vector<1x256xf32>
    %21 = vector.broadcast %18 : vector<8x1xf32> to vector<8x256xf32>
    %22 = vector.broadcast %20 : vector<1x256xf32> to vector<8x256xf32>
    %23 = arith.mulf %21, %22 : vector<8x256xf32>
    %24 = arith.addf %14, %23 : vector<8x256xf32>
    %c2_i32 = arith.constant 2 : i32
    %25 = arith.addi %1, %c2_i32 : i32
    %c0_10 = arith.constant 0 : index
    %26 = arith.index_cast %25 : i32 to index
    %c0_11 = arith.constant 0 : index
    %27 = vector.load %arg2[%c0_10, %26, %c0_11] : memref<1x12x1xf32, #tpu.memory_space<vmem>>, vector<1x8x1xf32>
    %28 = vector.shape_cast %27 : vector<1x8x1xf32> to vector<8x1xf32>
    %c2 = arith.constant 2 : index
    %c0_12 = arith.constant 0 : index
    %c0_13 = arith.constant 0 : index
    %29 = vector.load %arg3[%c2, %c0_12, %c0_13] : memref<5x1x256xf32, #tpu.memory_space<vmem>>, vector<1x1x256xf32>
    %30 = vector.shape_cast %29 : vector<1x1x256xf32> to vector<1x256xf32>
    %31 = vector.broadcast %28 : vector<8x1xf32> to vector<8x256xf32>
    %32 = vector.broadcast %30 : vector<1x256xf32> to vector<8x256xf32>
    %33 = arith.mulf %31, %32 : vector<8x256xf32>
    %34 = arith.addf %24, %33 : vector<8x256xf32>
    %c3_i32 = arith.constant 3 : i32
    %35 = arith.addi %1, %c3_i32 : i32
    %c0_14 = arith.constant 0 : index
    %36 = arith.index_cast %35 : i32 to index
    %c0_15 = arith.constant 0 : index
    %37 = vector.load %arg2[%c0_14, %36, %c0_15] : memref<1x12x1xf32, #tpu.memory_space<vmem>>, vector<1x8x1xf32>
    %38 = vector.shape_cast %37 : vector<1x8x1xf32> to vector<8x1xf32>
    %c3 = arith.constant 3 : index
    %c0_16 = arith.constant 0 : index
    %c0_17 = arith.constant 0 : index
    %39 = vector.load %arg3[%c3, %c0_16, %c0_17] : memref<5x1x256xf32, #tpu.memory_space<vmem>>, vector<1x1x256xf32>
    %40 = vector.shape_cast %39 : vector<1x1x256xf32> to vector<1x256xf32>
    %41 = vector.broadcast %38 : vector<8x1xf32> to vector<8x256xf32>
    %42 = vector.broadcast %40 : vector<1x256xf32> to vector<8x256xf32>
    %43 = arith.mulf %41, %42 : vector<8x256xf32>
    %44 = arith.addf %34, %43 : vector<8x256xf32>
    %c4_i32 = arith.constant 4 : i32
    %45 = arith.addi %1, %c4_i32 : i32
    %c0_18 = arith.constant 0 : index
    %46 = arith.index_cast %45 : i32 to index
    %c0_19 = arith.constant 0 : index
    %47 = vector.load %arg2[%c0_18, %46, %c0_19] : memref<1x12x1xf32, #tpu.memory_space<vmem>>, vector<1x8x1xf32>
    %48 = vector.shape_cast %47 : vector<1x8x1xf32> to vector<8x1xf32>
    %c4 = arith.constant 4 : index
    %c0_20 = arith.constant 0 : index
    %c0_21 = arith.constant 0 : index
    %49 = vector.load %arg3[%c4, %c0_20, %c0_21] : memref<5x1x256xf32, #tpu.memory_space<vmem>>, vector<1x1x256xf32>
    %50 = vector.shape_cast %49 : vector<1x1x256xf32> to vector<1x256xf32>
    %51 = vector.broadcast %48 : vector<8x1xf32> to vector<8x256xf32>
    %52 = vector.broadcast %50 : vector<1x256xf32> to vector<8x256xf32>
    %53 = arith.mulf %51, %52 : vector<8x256xf32>
    %54 = arith.addf %44, %53 : vector<8x256xf32>
    %55 = math.tanh %54 : vector<8x256xf32>
    %c0_22 = arith.constant 0 : index
    %c0_23 = arith.constant 0 : index
    %c0_24 = arith.constant 0 : index
    %56 = vector.load %arg5[%c0_22, %c0_23, %c0_24] : memref<1x8x256xf32, #tpu.memory_space<vmem>>, vector<1x8x256xf32>
    %57 = vector.shape_cast %56 : vector<1x8x256xf32> to vector<8x256xf32>
    %58 = vector.shape_cast %55 : vector<8x256xf32> to vector<1x8x256xf32>
    tpu.vector_store %arg5[%c0_22, %c0_23, %c0_24], %58 {strides = array<i32>} : memref<1x8x256xf32, #tpu.memory_space<vmem>>, vector<1x8x256xf32>,
    return
  }
  func.func @transform_0(%arg0: i32, %arg1: i32) -> (i32, i32, i32) {
    %c0_i32 = arith.constant 0 : i32
    %c0_i32_0 = arith.constant 0 : i32
    %c0_i32_1 = arith.constant 0 : i32
    return %arg0, %c0_i32, %c0_i32_0 : i32, i32, i32
  }
  func.func @transform_1(%arg0: i32, %arg1: i32) -> (i32, i32, i32) {
    %c0_i32 = arith.constant 0 : i32
    %c0_i32_0 = arith.constant 0 : i32
    %c0_i32_1 = arith.constant 0 : i32
    %c0_i32_2 = arith.constant 0 : i32
    return %c0_i32, %c0_i32_0, %c0_i32_1 : i32, i32, i32
  }
  func.func @transform_2(%arg0: i32, %arg1: i32) -> (i32, i32) {
    %c0_i32 = arith.constant 0 : i32
    %c0_i32_0 = arith.constant 0 : i32
    %c0_i32_1 = arith.constant 0 : i32
    return %c0_i32, %c0_i32_0 : i32, i32
  }
  func.func @transform_3(%arg0: i32, %arg1: i32) -> (i32, i32, i32) {
    %c0_i32 = arith.constant 0 : i32
    %c0_i32_0 = arith.constant 0 : i32
    return %arg0, %arg1, %c0_i32 : i32, i32, i32
  }
}

</mosaic_0001>

<bundles_post_ra>
// kernel: tpu_custom_call.1
= control target key start
LH: loop header
LB: loop body
LE: loop exit
PB: predicated region body
PF: predicated region fallthrough
CT: control target
= control target key end

     0   :  { %8 = vsyncpa [#allocation3], 0  ;;  %s692_s0 = inlined_call_operand.vmem [shape: f32[2,12,1], index: 0, kind: input, shape index: {}]   ;;  %s693_s1 = inlined_call_operand.vmem [shape: f32[5,1,256], index: 1, kind: input, shape index: {}]   ;;  %s694_s2 = inlined_call_operand.vmem [shape: f32[1,256], index: 2, kind: input, shape index: {}]   ;;  %s695_s3 = inlined_call_operand.hbm [shape: f32[2,8,256], index: 3, kind: output, shape index: {}]  }
   0x1   :  { %10 = vsyncpa [#allocation3 + $0x1], 0  ;;  %s577_s12 = smov 0   ;;  %s579_s13 = smov 0  }
   0x2   :  { %s581_s14 = smov 0   ;;  %s583_s15 = smov 0  }
   0x3   :  { %s585_s16 = smov 0   ;;  %s587_s17 = smov 0  }
   0x4 LB: > { %s390_s18 = sadd.s32 4294967295, %s554_s17   ;;  %s391_s19 = sadd.s32 4294967294, %s554_s17   ;;  %s554_s17 = sphi %s587_s17, %s16_s17   ;;  %s550_s16 = sphi %s585_s16, %s702_s16   ;;  %s546_s15 = sphi %s583_s15, %s701_s15   ;;  %s542_s14 = sphi %s581_s14, %s700_s14   ;;  %s538_s13 = sphi %s579_s13, %s699_s13   ;;  %s534_s12 = sphi %s577_s12, %s698_s12  }
   0x5   : > { %s28_s20 = sadd.s32 1, %s550_s16  ;;  %s105_s21 = sadd.s32 1, %s542_s14 }
   0x6   : > { %p30_p0 = scmp.ge.s32.totalorder %s28_s20, 2  ;;  %p115_p1 = scmp.ne.s32.totalorder %s542_s14, %s538_s13 }
   0x7   : > { %p116_p2 = scmp.eq.s32.totalorder %s390_s18, 1  ;;  %p121_p3 = scmp.ne.s32.totalorder %s538_s13, %s534_s12 }
   0x8   : > { %s704_s20 = smov (%p30_p0, %s28_s20), 0  ;;  %p122_p5 = scmp.eq.s32.totalorder %s391_s19, 1 }
   0x9   : > { %p617_p4 = por %p116_p2, %p115_p1  ;;  %s100_s23 = ssub.s32 %s550_s16, %s704_s20 }
   0xa   : > { %p394_p6 = scmp.ge.s32.totalorder %s554_s17, 1  ;;  %p103_p7 = scmp.eq.s32.totalorder %s100_s23, 0 }
   0xb   : > { %p624_p8 = por %p122_p5, %p121_p3  ;;  %p154_p9 = scmp.lt.s32.totalorder %s554_s17, 3 }
   0xc   : > { %s630_s25 = scalar_select %p103_p7, %s542_s14, %s105_s21  }
   0xd   : > { %p155_p10 = pnand %p394_p6, %p154_p9 }
   0xe   : > { %p178_p11 = scmp.lt.s32.totalorder (!%p155_p10), %s546_s15, 1  ;;  %s412_s28 = sshll.u32 (!%p155_p10), %s546_s15, 4 }
   0xf   : > { %158 = sbr.rel (%p155_p10) target bundleno = 170 (0xaa), region = 32  ;;  %s301_s4 = scalar_lea.hbm (!%p155_p10), %s695_s3, %s412_s28 }
  0x10   : > { %s305_s7 = sshll.u32 (!%p155_p10), %s301_s4, 4  ;;  %s496_s18 = scalar_lea.hbm (!%p155_p10), %s695_s3, 32  ;;  %s306_s7 = int_to_ptr.hbm [resolvable:$true] %s305_s7 }
  0x14   : > { %v556_v0 = vmov 0   ;;  %s179_s26 = scalar_select %p178_p11, %s546_s15, 1  ;;  %v192_v6 = vld [vmem:[%s693_s1] sm:$0x3]  ;;  %v399_v12 = vld [vmem:[%s693_s1 + $0x2] sm:$0x3] }
  0x15   : > { %470 = vset.pattern.permute.xlu1 %v556_v0  ;;  %469 = vset.pattern.permute.xlu0 %v556_v0  ;;  %v184_v9 = vld [vmem:[%s694_s2] sm:$0x3]  ;;  %v199_v10 = vperm.slane %v192_v6, 0  ;;  %v200_v11 = vperm.slane %v192_v6, 1  ;;  %v401_v13 = vld [vmem:[%s693_s1 + $0x4] sm:$0x3] }
  0x16   : > { %471 = vset.pattern.permute.xlu2 %v556_v0  ;;  %s411_s27 = sshll.u32 %s179_s26, 4  ;;  %v186_v14 = vperm.slane %v184_v9, 0  ;;  %v187_v15 = vperm.slane %v184_v9, 1  ;;  %v403_v18 = vld [vmem:[%s693_s1 + $0x6] sm:$0x3]  ;;  %v218_v19 = vperm.slane %v399_v12, 0 }
  0x17   : > { %s182_s30 = scalar_lea.vmem %s692_s0, %s411_s27  ;;  %v219_v20 = vperm.slane %v399_v12, 1  ;;  %v405_v21 = vld [vmem:[%s693_s1 + $0x8] sm:$0x3]  ;;  %v237_v22 = vperm.slane %v401_v13, 0  ;;  %v238_v23 = vperm.slane %v401_v13, 1  ;;  %v256_v24 = vperm.slane %v403_v18, 0 }
  0x18   : > { %v400_v1 = vld [vmem:[%s182_s30 + $0x2] sm:$0xff]  ;;  %v257_v25 = vperm.slane %v403_v18, 1  ;;  %v275_v27 = vperm.slane %v405_v21, 0  ;;  %v276_v28 = vperm.slane %v405_v21, 1  ;;  %s175_s26 = sand.u32 1, %s538_s13   ;;  %s490_s15 = sshra.s32 %s306_s7, 4  ;;  %s491_s15 = int_to_ptr.hbm [resolvable:$true] %s490_s15 }
  0x19   : > { %v191_v2 = vld [vmem:[%s182_s30] sm:$0xff]  ;;  %233 = vperm.xlu1 %470, %v400_v1   ;;  %s395_s27 = sshll.u32 %s175_s26, 4  ;;  %s288_s8 = scalar_lea.sflag [#allocation3], %s175_s26 }
  0x1a   : > { %195 = vperm.xlu0 %469, %v191_v2   ;;  %v404_v3 = vld [vmem:[%s182_s30 + $0x4] sm:$0xff]  ;;  %s177_s5 = scalar_lea.vmem [#allocation2], %s395_s27  ;;  %s492_s9 = scalar_lea.hbm %s491_s15, 16 }
  0x1b   : > { %271 = vperm.xlu2 %471, %v404_v3   ;;  %v402_v4 = vld [vmem:[%s182_s30 + $0x3] sm:$0xff]  ;;  %s303_s6 = sshll.u32 %s177_s5, 4  ;;  %p493_p12 = scmp.ne.s32.totalorder %s491_s15, %s492_s9  ;;  %s304_s6 = int_to_ptr.vmem [resolvable:$true] %s303_s6 }
  0x1c   : > { %v398_v5 = vld [vmem:[%s182_s30 + $0x1] sm:$0xff]  ;;  %p497_p1 = scmp.lt.s32.totalorder %s491_s15, %s695_s3  ;;  %p498_p2 = scmp.lt.s32.totalorder %s496_s18, %s492_s9 }
  0x1d   : > { %p494_p13 = pnand %p493_p12, %p617_p4 }
  0x1e   : > { %p499_p3 = por %p498_p2, %p497_p1 }
  0x1f   : > { %p495_p0 = pneg %p494_p13 }
  0x21   : > { %252 = vperm.xlu1 %470, %v402_v4   ;;  %p500_p5 = pnand %p499_p3, %p495_p0 }
  0x22   : > { %214 = vperm.xlu0 %469, %v398_v5  }
  0x75   : > { %v272_v33 = vpop.permute.xlu2 %271 }
  0x76   : > { %v279_v39 = vmul.f32 %v275_v27, %v272_v33  ;;  %v280_v40 = vmul.f32 %v276_v28, %v272_v33 }
  0x8b   : > { %v234_v7 = vpop.permute.xlu1 %233 }
  0x8c   : > { %v196_v8 = vpop.permute.xlu0 %195  ;;  %v241_v35 = vmul.f32 %v237_v22, %v234_v7  ;;  %v242_v36 = vmul.f32 %v238_v23, %v234_v7 }
  0x8d   : > { %v203_v16 = vmul.f32 %v199_v10, %v196_v8  ;;  %v204_v17 = vmul.f32 %v200_v11, %v196_v8 }
  0x8f   : > { %v205_v29 = vadd.f32 %v203_v16, %v186_v14  ;;  %v206_v30 = vadd.f32 %v204_v17, %v187_v15 }
  0x93   : > { %v253_v34 = vpop.permute.xlu1 %252 }
  0x94   : > { %v215_v26 = vpop.permute.xlu0 %214  ;;  %v260_v41 = vmul.f32 %v256_v24, %v253_v34  ;;  %v261_v42 = vmul.f32 %v257_v25, %v253_v34 }
  0x95   : > { %v222_v31 = vmul.f32 %v218_v19, %v215_v26  ;;  %v223_v32 = vmul.f32 %v219_v20, %v215_v26 }
  0x97   : > { %v224_v37 = vadd.f32 %v222_v31, %v205_v29  ;;  %v225_v38 = vadd.f32 %v223_v32, %v206_v30 }
  0x99   : > { %v243_v43 = vadd.f32 %v241_v35, %v224_v37  ;;  %v244_v44 = vadd.f32 %v242_v36, %v225_v38 }
  0x9b   : > { %v262_v45 = vadd.f32 %v260_v41, %v243_v43  ;;  %v263_v46 = vadd.f32 %v261_v42, %v244_v44 }
  0x9d   : > { %v281_v47 = vadd.f32 %v279_v39, %v262_v45  ;;  %v282_v48 = vadd.f32 %v280_v40, %v263_v46 }
  0x9f   : > { %472 = vtanh.f32 %v281_v47 }
  0xa0   : > { %474 = vtanh.f32 %v282_v48 }
  0xa5   : > { %v473_v49 = vpop.eup %472 }
  0xa6   : > { %v475_v50 = vpop.eup %474  ;;  %285 = vst [vmem:[%s177_s5] sm:$0xff] %v473_v49 }
  0xa7   : > { %286 = vst [vmem:[%s177_s5 + $0x8] sm:$0xff] %v475_v50 }
  0xa8   : > { %503 = shalt.err (!%p500_p5)
}
  0xa9   : > { %413 = dma.vmem_to_hbm [thread:$0]  (%p617_p4), %s304_s6, 256, %s306_s7, %s288_s8  }
  0xaa PF: > { %p419_p6 = scmp.ge.s32.totalorder %s554_s17, 2  ;;  %s317_s23 = sand.u32 1, %s534_s12  }
  0xab   : > { %s318_s26 = scalar_lea.sflag [#allocation3], %s317_s23 }
  0xac   : > { %p416_p7 = pnand %p419_p6, %p624_p8 }
  0xae   : > { %p417_p9 = pneg %p416_p7 }
  0xb0   : > { %529 = dma.done.wait (%p417_p9), %s318_s26, 256  }
  0xb1   : > { %531 = vsyncadd (%p417_p9), %s318_s26, 4294967040  ;;  %s16_s17 = sadd.s32 1, %s554_s17   ;;  %s698_s12 = smov %s538_s13 }
  0xb2   : > { %p13_p10 = scmp.ge.s32.totalorder %s16_s17, 4   ;;  %s699_s13 = smov %s542_s14 }
  0xb3   : > { %s700_s14 = smov %s630_s25  ;;  %s701_s15 = smov %s550_s16 }
  0xb4   : > { %s702_s16 = smov %s704_s20  ;;  %15 = sbr.rel (!%p13_p10) target bundleno = 4 (0x4), region = 76 }
  0xb9   :  { %324 = vsyncpa [#allocation3], 1 }
  0xba   :  { %326 = vsyncpa [#allocation3 + $0x1], 1 }

</bundles_post_ra>
